<compile_context>
chip_gen: v7x
topology: tpu7x:2x2x1
jax: 0.10.0
libtpu: 0.0.40
codegen_flags: <defaults>
</compile_context>

<pallas_src>
import functools
import math

import jax
import jax.numpy as jnp
from jax.experimental import pallas as pl
from jax.experimental.pallas import tpu as pltpu

LANE = 128
DEFAULT_TM_CAP = 256                 # v5e/v7x safe; raise to 512-1024 on v6e
VMEM_LIMIT_BYTES = 32 * 1024 * 1024  # explicit scoped-VMEM budget


def _round_up(x, m):
    return ((x + m - 1) // m) * m


def _choose_tm(M, tm_cap):
    """Row-tile size: capped for VMEM, but >=2 tiles whenever possible so the
    "parallel" grid axis shards across both TensorCores on v7x."""
    tm = min(tm_cap, _round_up(pl.cdiv(M, 2), 8))
    return max(tm, 8)


def _pad2(a, rows, cols):
    return jnp.pad(a, ((0, rows - a.shape[0]), (0, cols - a.shape[1])))


# ----------------------------- Pallas kernels ------------------------------

def _linear_kernel(x_ref, w_ref, b_ref, o_ref):
    # x: (TM, Din) f32, w: (Din, Dout) bf16 (pre-cast), b: (1, Dout) f32.
    o_ref[...] = (
        jnp.dot(x_ref[...].astype(jnp.bfloat16), w_ref[...],
                preferred_element_type=jnp.float32)
        + b_ref[...]
    )


def linear(x2d, w_bf16, b_row, *, tm_cap=DEFAULT_TM_CAP):
    """y = x @ w + b, tiled over M with a 'parallel' grid (megacore-shardable)."""
    M, Din = x2d.shape
    Dout = w_bf16.shape[1]
    tm = _choose_tm(M, tm_cap)
    Mp = _round_up(M, tm)
    if Mp != M:
        x2d = jnp.pad(x2d, ((0, Mp - M), (0, 0)))
    out = pl.pallas_call(
        _linear_kernel,
        out_shape=jax.ShapeDtypeStruct((Mp, Dout), jnp.float32),
        grid=(Mp // tm,),
        in_specs=[
            pl.BlockSpec((tm, Din), lambda i: (i, 0)),
            pl.BlockSpec((Din, Dout), lambda i: (0, 0)),
            pl.BlockSpec((1, Dout), lambda i: (0, 0)),
        ],
        out_specs=pl.BlockSpec((tm, Dout), lambda i: (i, 0)),
        compiler_params=pltpu.CompilerParams(
            dimension_semantics=("parallel",),
            vmem_limit_bytes=VMEM_LIMIT_BYTES),
    )(x2d, w_bf16, b_row)
    return out[:M]


def _s4_post_conv_kernel(u_ref, c_ref, d_ref, w_ref, b_ref, g_ref, beta_ref,
                         o_ref, *, real_h):
    """Post-conv part of one S4 block on a (TM, Hp) row tile:
    D-skip + GELU + fused GLU output linear + residual + LayerNorm."""
    u = u_ref[...]                                   # (TM, Hp) f32 residual base
    conv = c_ref[...].astype(jnp.float32)            # streamed bf16 -> f32 math
    hp = u.shape[-1]

    y = conv + u * d_ref[...]                        # SSM conv + u * D skip
    # TODO(synk): PyTorch F.gelu default is the exact erf form; Mosaic has no
    # guaranteed erf lowering, so the tanh-approximate GELU is used here.
    y = jax.nn.gelu(y, approximate=True)

    # Fused output linear (Hp -> 2*Hp): value half = cols [0, Hp),
    # gate half = cols [Hp, 2*Hp)  (matches nn.GLU split order), then GLU.
    z = jnp.dot(y.astype(jnp.bfloat16), w_ref[...],
                preferred_element_type=jnp.float32) + b_ref[...]
    xr = z[:, :hp] * jax.nn.sigmoid(z[:, hp:]) + u   # GLU + residual

    # LayerNorm over the REAL H lanes.  Padded lanes of xr are exactly 0, so
    # sum / sum-of-squares over all Hp lanes equal the sums over the real H
    # lanes (no iota/mask tile needed).  gamma/beta are 0 on padded lanes,
    # which keeps the padded output lanes exactly 0 for the next layer.
    inv_h = 1.0 / real_h
    mu = jnp.sum(xr, axis=-1, keepdims=True) * inv_h
    ex2 = jnp.sum(xr * xr, axis=-1, keepdims=True) * inv_h
    var = jnp.maximum(ex2 - mu * mu, 0.0)
    o_ref[...] = ((xr - mu) * jax.lax.rsqrt(var + 1e-5)
                  * g_ref[...] + beta_ref[...])


def s4_layer_post_conv(u2d, conv2d_bf16, d_row, w_cat, b_cat, gamma_row,
                       beta_row, real_h, *, tm_cap=DEFAULT_TM_CAP):
    M, Hp = u2d.shape
    tm = _choose_tm(M, tm_cap)
    Mp = _round_up(M, tm)
    if Mp != M:
        pad = ((0, Mp - M), (0, 0))
        u2d = jnp.pad(u2d, pad)
        conv2d_bf16 = jnp.pad(conv2d_bf16, pad)
    kern = functools.partial(_s4_post_conv_kernel, real_h=real_h)
    full = lambda i: (0, 0)
    out = pl.pallas_call(
        kern,
        out_shape=jax.ShapeDtypeStruct((Mp, Hp), jnp.float32),
        grid=(Mp // tm,),
        in_specs=[
            pl.BlockSpec((tm, Hp), lambda i: (i, 0)),     # u (f32)
            pl.BlockSpec((tm, Hp), lambda i: (i, 0)),     # conv(u) (bf16 stream)
            pl.BlockSpec((1, Hp), full),                  # D skip
            pl.BlockSpec((Hp, 2 * Hp), full),             # fused GLU weight (bf16)
            pl.BlockSpec((1, 2 * Hp), full),              # fused GLU bias
            pl.BlockSpec((1, Hp), full),                  # LayerNorm gamma
            pl.BlockSpec((1, Hp), full),                  # LayerNorm beta
        ],
        out_specs=pl.BlockSpec((tm, Hp), lambda i: (i, 0)),
        compiler_params=pltpu.CompilerParams(
            dimension_semantics=("parallel",),
            vmem_limit_bytes=VMEM_LIMIT_BYTES),
    )(u2d, conv2d_bf16, d_row, w_cat, b_cat, gamma_row, beta_row)
    return out[:M]


# ------------------------- parameter / SSM glue -----------------------------

def s4d_ssm_conv_kernel(log_dt, log_A_real, A_imag, C, L):
    """S4D (diagonal SSM, ZOH discretization) convolution kernel, shape (H, L)."""
    dt = jnp.exp(log_dt)[:, None]                      # (H, 1)
    A = -jnp.exp(log_A_real) + 1j * A_imag             # (H, N)
    dtA = A * dt
    C_disc = C * (jnp.exp(dtA) - 1.0) / A
    vand = jnp.exp(dtA[:, :, None]
                   * jnp.arange(L, dtype=jnp.float32)[None, None, :])
    K = 2.0 * jnp.real(jnp.sum(C_disc[:, :, None] * vand, axis=1))
    return K.astype(jnp.float32)


def causal_depthwise_conv_fft(u_blh, k_lh):
    """y[b,l,h] = sum_{s<=l} k[s,h]*u[b,l-s,h] via FFT, run at the REAL width H.
    Result is emitted in bf16 (streamed straight into the fused kernel)."""
    _, L, _ = u_blh.shape
    n = 1 << max(1, (2 * L - 1).bit_length())          # pow2 >= 2L-1
    Uf = jnp.fft.rfft(u_blh, n=n, axis=1)
    Kf = jnp.fft.rfft(k_lh, n=n, axis=0)[None]
    y = jnp.fft.irfft(Uf * Kf, n=n, axis=1)[:, :L, :]
    return y.astype(jnp.bfloat16)


def init_params(key, input_dim, output_dim, model_dim, nlayers, d_state=16):
    H, N = model_dim, d_state // 2
    Hp = _round_up(H, LANE)
    Dout_p = _round_up(output_dim, LANE)
    keys = jax.random.split(key, 2 + nlayers)
    embed_w = (jax.random.normal(keys[0], (input_dim, H), jnp.float32)
               / math.sqrt(input_dim))
    dec_w = (jax.random.normal(keys[1], (H, output_dim), jnp.float32)
             / math.sqrt(H))
    p = {
        "H": H, "Hp": Hp, "output_dim": output_dim,
        "embed_w": _pad2(embed_w, input_dim, Hp).astype(jnp.bfloat16),
        "embed_b": jnp.zeros((1, Hp), jnp.float32),
        "dec_w": _pad2(dec_w, Hp, Dout_p).astype(jnp.bfloat16),
        "dec_b": jnp.zeros((1, Dout_p), jnp.float32),
        "layers": [],
    }
    for i in range(nlayers):
        lk = jax.random.split(keys[2 + i], 6)
        log_dt = (jax.random.uniform(lk[0], (H,), jnp.float32)
                  * (math.log(0.1) - math.log(0.001)) + math.log(0.001))
        log_A_real = jnp.log(0.5 * jnp.ones((H, N), jnp.float32))
        A_imag = math.pi * jnp.broadcast_to(
            jnp.arange(N, dtype=jnp.float32), (H, N))
        C = (jax.random.normal(lk[1], (H, N), jnp.float32)
             + 1j * jax.random.normal(lk[2], (H, N), jnp.float32)) * (0.5 ** 0.5)
        D = jax.random.normal(lk[3], (H,), jnp.float32)
        wo1 = jax.random.normal(lk[4], (H, H), jnp.float32) / math.sqrt(H)
        wo2 = jax.random.normal(lk[5], (H, H), jnp.float32) / math.sqrt(H)
        bo1 = jnp.zeros((H,), jnp.float32)
        bo2 = jnp.zeros((H,), jnp.float32)
        # Fused, lane-padded GLU weight/bias (value half first, gate half second).
        w_cat = jnp.zeros((Hp, 2 * Hp), jnp.float32)
        w_cat = w_cat.at[:H, :H].set(wo1).at[:H, Hp:Hp + H].set(wo2)
        b_cat = jnp.zeros((1, 2 * Hp), jnp.float32)
        b_cat = b_cat.at[0, :H].set(bo1).at[0, Hp:Hp + H].set(bo2)
        p["layers"].append(dict(
            log_dt=log_dt, log_A_real=log_A_real, A_imag=A_imag, C=C,
            D=jnp.pad(D, (0, Hp - H)).reshape(1, Hp),
            w_cat=w_cat.astype(jnp.bfloat16), b_cat=b_cat,
            gamma=jnp.pad(jnp.ones((H,), jnp.float32),
                          (0, Hp - H)).reshape(1, Hp),
            beta=jnp.zeros((1, Hp), jnp.float32),
        ))
    return p


# ------------------------------ model forward -------------------------------

def _decode(params, h_bld):
    B, Ls, Hp = h_bld.shape
    out = linear(h_bld.reshape(B * Ls, Hp), params["dec_w"], params["dec_b"])
    return out[:, :params["output_dim"]].reshape(B, Ls, params["output_dim"])


def s4_model_hidden(params, x):
    """Embed + nlayers S4 blocks. x: (B, L, Din) -> lane-padded (B, L, Hp)."""
    B, L, Din = x.shape
    H, Hp = params["H"], params["Hp"]
    h = linear(x.reshape(B * L, Din), params["embed_w"], params["embed_b"])
    h = h.reshape(B, L, Hp)                      # padded lanes [H:Hp) are zero
    for lp in params["layers"]:
        K = s4d_ssm_conv_kernel(lp["log_dt"], lp["log_A_real"],
                                lp["A_imag"], lp["C"], L)        # (H, L)
        conv = causal_depthwise_conv_fft(h[..., :H], K.T)        # (B, L, H) bf16
        conv = jnp.pad(conv, ((0, 0), (0, 0), (0, Hp - H)))      # lane pad, bf16
        h = s4_layer_post_conv(
            h.reshape(B * L, Hp), conv.reshape(B * L, Hp),
            lp["D"], lp["w_cat"], lp["b_cat"], lp["gamma"], lp["beta"], H,
        ).reshape(B, L, Hp)
    return h


def s4_model_forward(params, x):
    """Full S4Model.forward (prenorm=False, eval mode, lengths=None)."""
    return _decode(params, s4_model_hidden(params, x))


def low_freq_predictor_forward(params, x, pred_freq_ratio):
    """LowFreqPredictor.forward: model(x)[:, ::pred_freq_ratio].  The decoder is
    position-wise, so the stride is applied before decoding (same result)."""
    h = s4_model_hidden(params, x)
    return _decode(params, h[:, ::pred_freq_ratio])


if __name__ == "__main__":
    B, L = 2, 16
    input_dim, output_dim, model_dim, nlayers = 4, 6, 32, 4
    pred_freq_ratio = 2

    key = jax.random.PRNGKey(0)
    pkey, xkey = jax.random.split(key)
    params = init_params(pkey, input_dim, output_dim, model_dim, nlayers)
    x = jax.random.normal(xkey, (B, L, input_dim), jnp.float32)

    y = low_freq_predictor_forward(params, x, pred_freq_ratio)
    jax.block_until_ready(y)
    assert y.shape == (B, -(-L // pred_freq_ratio), output_dim)
    print("KERNEL_OK")
</pallas_src>

<mosaic_0001>
module attributes {stable_mosaic.version = 11 : i64} {
  func.func @_linear_kernel(%arg0: i32, %arg1: memref<16x4xf32, #tpu.memory_space<vmem>>, %arg2: memref<4x128xbf16, #tpu.memory_space<vmem>>, %arg3: memref<1x128xf32, #tpu.memory_space<vmem>>, %arg4: memref<16x128xf32, #tpu.memory_space<vmem>>) attributes {dimension_semantics = [#tpu.dimension_semantics<parallel>], iteration_bounds = array<i64: 2>, scalar_prefetch = 0 : i64, scratch_operands = 0 : i64, tpu.core_type = #tpu.core_type<tc>, window_params = [{transform_indices = @transform_0, window_bounds = array<i64: 16, 4>}, {pipeline_mode = #tpu.pipeline_mode<synchronous>, transform_indices = @transform_1, window_bounds = array<i64: 4, 128>}, {pipeline_mode = #tpu.pipeline_mode<synchronous>, transform_indices = @transform_2, window_bounds = array<i64: 1, 128>}, {transform_indices = @transform_3, window_bounds = array<i64: 16, 128>}]} {
    %c0 = arith.constant 0 : index
    %c0_0 = arith.constant 0 : index
    %0 = vector.load %arg1[%c0, %c0_0] : memref<16x4xf32, #tpu.memory_space<vmem>>, vector<16x4xf32>
    %1 = arith.truncf %0 : vector<16x4xf32> to vector<16x4xbf16>
    %c0_1 = arith.constant 0 : index
    %c0_2 = arith.constant 0 : index
    %2 = vector.load %arg2[%c0_1, %c0_2] : memref<4x128xbf16, #tpu.memory_space<vmem>>, vector<4x128xbf16>
    %cst = arith.constant dense<0.000000e+00> : vector<16x128xf32>
    %3 = tpu.matmul %1, %2, %cst {dimension_numbers = #tpu.dot_dimension_numbers<[1], [0], [0], [1], [0, 0, 1, 1], [], []>} : vector<16x4xbf16>, vector<4x128xbf16>, vector<16x128xf32> -> vector<16x128xf32>
    %c0_3 = arith.constant 0 : index
    %c0_4 = arith.constant 0 : index
    %4 = vector.load %arg3[%c0_3, %c0_4] : memref<1x128xf32, #tpu.memory_space<vmem>>, vector<1x128xf32>
    %5 = vector.broadcast %4 : vector<1x128xf32> to vector<16x128xf32>
    %6 = arith.addf %3, %5 : vector<16x128xf32>
    %c0_5 = arith.constant 0 : index
    %c0_6 = arith.constant 0 : index
    %7 = vector.load %arg4[%c0_5, %c0_6] : memref<16x128xf32, #tpu.memory_space<vmem>>, vector<16x128xf32>
    tpu.vector_store %arg4[%c0_5, %c0_6], %6 {strides = array<i32>} : memref<16x128xf32, #tpu.memory_space<vmem>>, vector<16x128xf32>,
    return
  }
  func.func @transform_0(%arg0: i32) -> (i32, i32) {
    %c0_i32 = arith.constant 0 : i32
    %c0_i32_0 = arith.constant 0 : i32
    return %arg0, %c0_i32 : i32, i32
  }
  func.func @transform_1(%arg0: i32) -> (i32, i32) {
    %c0_i32 = arith.constant 0 : i32
    %c0_i32_0 = arith.constant 0 : i32
    %c0_i32_1 = arith.constant 0 : i32
    return %c0_i32, %c0_i32_0 : i32, i32
  }
  func.func @transform_2(%arg0: i32) -> (i32, i32) {
    %c0_i32 = arith.constant 0 : i32
    %c0_i32_0 = arith.constant 0 : i32
    %c0_i32_1 = arith.constant 0 : i32
    return %c0_i32, %c0_i32_0 : i32, i32
  }
  func.func @transform_3(%arg0: i32) -> (i32, i32) {
    %c0_i32 = arith.constant 0 : i32
    %c0_i32_0 = arith.constant 0 : i32
    return %arg0, %c0_i32 : i32, i32
  }
}

</mosaic_0001>

<bundles_post_ra>
// kernel: tpu_custom_call.1
= control target key start
LH: loop header
LB: loop body
LE: loop exit
PB: predicated region body
PF: predicated region fallthrough
CT: control target
= control target key end

     0   :  { %8 = vsyncpa [#allocation3], 0  ;;  %s574_s0 = inlined_call_operand.vmem [shape: f32[32,4], index: 0, kind: input, shape index: {}]   ;;  %s575_s1 = inlined_call_operand.vmem [shape: bf16[4,128], index: 1, kind: input, shape index: {}]   ;;  %s576_s2 = inlined_call_operand.vmem [shape: f32[1,128], index: 2, kind: input, shape index: {}]   ;;  %s577_s3 = inlined_call_operand.hbm [shape: f32[32,128], index: 3, kind: output, shape index: {}]  }
   0x1   :  { %10 = vsyncpa [#allocation3 + $0x1], 0  ;;  %s466_s12 = smov 0   ;;  %s468_s13 = smov 0  }
   0x2   :  { %s470_s14 = smov 0   ;;  %s472_s15 = smov 0  }
   0x3 LB: > { %s487_s16 = sadd.s32 4294967295, %s439_s15   ;;  %s311_s17 = sadd.s32 4294967294, %s439_s15   ;;  %s439_s15 = sphi %s472_s15, %s583_s15   ;;  %s435_s14 = sphi %s470_s14, %s582_s14   ;;  %s431_s13 = sphi %s468_s13, %s581_s13   ;;  %s427_s12 = sphi %s466_s12, %s580_s12  }
   0x4   : > { %s491_s18 = sadd.s32 1, %s439_s15   ;;  %s91_s19 = sadd.s32 1, %s435_s14 }
   0x5   : > { %s88_s20 = ssub.s32 %s439_s15, %s491_s18  ;;  %p101_p0 = scmp.ne.s32.totalorder %s435_s14, %s431_s13 }
   0x6   : > { %p89_p1 = scmp.eq.s32.totalorder %s88_s20, 0  ;;  %p102_p2 = scmp.eq.s32.totalorder %s487_s16, 1 }
   0x7   : > { %p107_p3 = scmp.ne.s32.totalorder %s431_s13, %s427_s12  ;;  %p108_p4 = scmp.eq.s32.totalorder %s311_s17, 1 }
   0x8   : > { %s502_s21 = scalar_select %p89_p1, %s435_s14, %s91_s19  }
   0x9   : > { %p504_p5 = por %p102_p2, %p101_p0  ;;  %p508_p6 = por %p108_p4, %p107_p3 }
   0xa   : > { %p314_p7 = scmp.ge.s32.totalorder %s439_s15, 1  ;;  %p141_p8 = scmp.lt.s32.totalorder %s439_s15, 3 }
   0xc   : > { %p142_p9 = pnand %p314_p7, %p141_p8 }
   0xd   : > { %v176_v0 = vld [vmem:[%s575_s1] sm:$0x3] (!%p142_p9)  ;;  %vm188_vm0 = vcmask (!%p142_p9), 1041408   ;;  %s316_s26 = sshll.u32 (!%p142_p9), %s487_s16, 1  ;;  %v441_v1 = vmov (!%p142_p9), 0.0   ;;  %vm442_vm1 = vmmov (!%p142_p9), 0  }
   0xe   : > { %145 = sbr.rel (%p142_p9) target bundleno = 258 (0x102), region = 32  ;;  %328 = vmatprep.subr.bf16.mxu0 (!%p142_p9), %v441_v1  ;;  %v190_v2 = vsel (!%p142_p9), %vm188_vm0, %v176_v0, 0  ;;  %330 = vmatprep.mubr.msk.bf16.mxu0 (!%p142_p9), %vm442_vm1, %v441_v1  ;;  %p166_p10 = scmp.lt.s32.totalorder (!%p142_p9), %s316_s26, 3  ;;  %vm184_vm2 = vcmask (!%p142_p9), 31744   ;;  %v318_v6 = vld [vmem:[%s576_s2] ss:$0 sm:$0xff] (!%p142_p9) }
   0xf   : > { %329 = vmatpush3.bf16.msra.mxu0 (!%p142_p9), %v190_v2  ;;  %s162_s4 = sand.u32 (!%p142_p9), 1, %s431_s13   ;;  %s325_s10 = sshll.u32 (!%p142_p9), %s487_s16, 8 }
  0x10   : > { %s315_s5 = sshll.u32 (!%p142_p9), %s162_s4, 4  ;;  %s531_s19 = scalar_lea.hbm (!%p142_p9), %s577_s3, %s325_s10 }
  0x11   : > { %s164_s8 = scalar_lea.vmem (!%p142_p9), [#allocation2], %s315_s5  ;;  %s533_s20 = scalar_lea.sflag (!%p142_p9), [#allocation3], %s162_s4 }
  0x12   : > { %s249_s9 = sshll.u32 (!%p142_p9), %s164_s8, 4  ;;  %s443_s24 = smov (!%p142_p9), [#allocation2]   ;;  %s526_s9 = int_to_ptr.vmem [resolvable:$true] %s249_s9 }
  0x13   : > { %s377_s16 = scalar_lea.vmem (!%p142_p9), %s526_s9, 256  ;;  %s381_s25 = sshll.u32 (!%p142_p9), %s443_s24, 4  ;;  %s382_s25 = int_to_ptr.vmem [resolvable:$false] %s381_s25 }
  0x14   : > { %p378_p11 = scmp.ne.s32.totalorder (!%p142_p9), %s526_s9, %s377_s16  ;;  %p384_p0 = scmp.lt.s32.totalorder (!%p142_p9), %s526_s9, %s382_s25 }
  0x15   : > { %s585_s26 = smov (!%p166_p10, %s316_s26), 3 }
  0x16   : > { %s317_s27 = sshll.u32 %s585_s26, 3  ;;  %p379_p12 = pnand %p378_p11, %p504_p5 }
  0x17   : > { %s169_s30 = scalar_lea.vmem %s574_s0, %s317_s27  ;;  %s383_s26 = scalar_lea.vmem %s382_s25, 512 }
  0x18   : > { %v173_v3 = vld [vmem:[%s169_s30] sm:$0xff]  ;;  %v174_v4 = vld [vmem:[%s169_s30 + $0x8] sm:$0xff]  ;;  %p380_p13 = pneg %p379_p12  ;;  %p385_p1 = scmp.lt.s32.totalorder %s383_s26, %s377_s16 }
  0x19   : > { %v175_v5 = vpack.c.bf16 %v174_v4, %v173_v3 }
  0x1a   : > { %p386_p2 = por %p385_p1, %p384_p0 }
  0x1b   : > { %331 = vmatmul.mubr.msk.bf16.vlgmr.msra.gmra.mrb[0].mxu0 %vm184_vm2, %v175_v5 }
  0x1c   : > { %p387_p3 = pnand %p386_p2, %p380_p13 }
  0xee   : > { %v226_v7 = vpop.f32.mrb[0].mxu0 }
  0xef   : > { %v227_v8 = vadd.f32 %v318_v6, %v226_v7  ;;  %v332_v9 = vpop.f32.mrb[1].mxu0 }
  0xf0   : > { %v229_v10 = vpop.f32.mrb[2].mxu0 }
  0xf1   : > { %233 = vst [vmem:[%s164_s8] sm:$0xff] %v227_v8  ;;  %v230_v11 = vadd.f32 %v318_v6, %v229_v10  ;;  %v333_v12 = vpop.f32.mrb[3].mxu0 }
  0xf3   : > { %234 = vst [vmem:[%s164_s8 + $0x8] sm:$0xff] %v230_v11 }
  0xf4   : > { %390 = shalt.err (!%p387_p3)
}
  0xf5   : > { %s391_s27 = scalar_lea.hbm %s531_s19, 256  ;;  %s395_s30 = scalar_lea.hbm %s577_s3, 512 }
  0xf6   : > { %p392_p4 = scmp.ne.s32.totalorder %s531_s19, %s391_s27  ;;  %p396_p9 = scmp.lt.u32.totalorder %s531_s19, %s577_s3 }
  0xf7   : > { %p397_p10 = scmp.lt.u32.totalorder %s395_s30, %s391_s27  ;;  %p399_p12 = scmp.lt.u32.totalorder %s391_s27, %s531_s19 }
  0xf8   : > { %p393_p7 = pnand %p392_p4, %p504_p5 }
  0xf9   : > { %p398_p11 = por %p397_p10, %p396_p9 }
  0xfa   : > { %p394_p8 = pneg %p393_p7 }
  0xfb   : > { %p400_p13 = por %p399_p12, %p398_p11 }
  0xfd   : > { %p401_p0 = pnand %p400_p13, %p394_p8 }
  0xff   : > { %404 = shalt.err (!%p401_p0)
}
 0x100   : > { %s444_s6 = smov 128   ;;  %s445_s7 = smov 8  }
 0x101   : > { %334 = dma.vmem_to_hbm [thread:$0]  (%p504_p5), %s526_s9, 256, %s531_s19, %s533_s20, %s444_s6, %s444_s6, %s445_s7  }
 0x102 PF: > { %p340_p1 = scmp.ge.s32.totalorder %s439_s15, 2  ;;  %s264_s8 = sand.u32 1, %s427_s12  }
 0x103   : > { %s265_s10 = scalar_lea.sflag [#allocation3], %s264_s8 }
 0x104   : > { %p337_p2 = pnand %p340_p1, %p508_p6 }
 0x106   : > { %422 = dma.done.wait (!%p337_p2), %s265_s10, 256  }
 0x107   : > { %424 = vsyncadd (!%p337_p2), %s265_s10, 4294967040  ;;  %p13_p3 = scmp.ge.s32.totalorder %s491_s18, 4   ;;  %s580_s12 = smov %s431_s13 }
 0x108   : > { %s581_s13 = smov %s435_s14  ;;  %s582_s14 = smov %s502_s21 }
 0x109   : > { %s583_s15 = smov %s491_s18  ;;  %15 = sbr.rel (!%p13_p3) target bundleno = 3 (0x3), region = 67 }
 0x110   :  { %270 = vsyncpa [#allocation3], 1 }
 0x111   :  { %272 = vsyncpa [#allocation3 + $0x1], 1 }

</bundles_post_ra>
